<compile_context>
chip_gen: v6e
topology: v6e:2x2x1
jax: 0.10.0
libtpu: 0.0.40
codegen_flags: <defaults>
</compile_context>

<pallas_src>
import jax
import jax.numpy as jnp
from jax.experimental import pallas as pl
from jax.experimental.pallas import tpu as pltpu

_LANE = 128


def _round_up(x, m):
    return ((x + m - 1) // m) * m


def _wce_kernel(x_ref, lbl_ref, w_ref, o_ref):
    # Block shapes: x -> (C, TA); lbl / w / o -> (1, TA). Anchors on the lane axis.
    x = x_ref[...].astype(jnp.float32)        # (C, TA)
    lbl = lbl_ref[...]                        # (1, TA) int32
    w = w_ref[...].astype(jnp.float32)        # (1, TA)

    # Numerically stable logsumexp over the class (sublane) axis.
    m = jnp.max(x, axis=0, keepdims=True)                               # (1, TA)
    lse = m + jnp.log(jnp.sum(jnp.exp(x - m), axis=0, keepdims=True))   # (1, TA)

    # Target-class logit via an iota mask over the class axis (== gather of argmax).
    cls = jax.lax.broadcasted_iota(jnp.int32, x.shape, 0)               # (C, TA)
    tgt = jnp.sum(jnp.where(cls == lbl, x, 0.0), axis=0, keepdims=True)  # (1, TA)

    o_ref[...] = ((lse - tgt) * w).astype(o_ref.dtype)


def weighted_cross_entropy_loss(logits, target, weights, *, block_anchors=None):
    """Pallas equivalent of WeightedCrossEntropyLoss(use_sigmoid=False).forward."""
    B, A, C = logits.shape
    N = B * A

    # Integer labels once, outside the kernel: matches torch argmax semantics and
    # shrinks the streamed target bytes (int32 (N,) instead of f32 (N, C)).
    labels = jnp.argmax(target, axis=-1).astype(jnp.int32).reshape(N)   # (N,)

    # Anchors-on-lanes layout: (B, A, C) -> (N, C) (free reshape) -> (C, N).
    x_t = jnp.transpose(logits.reshape(N, C), (1, 0))                   # (C, N)
    w_flat = weights.reshape(N)

    # Anchor tile: multiple of 128, capped so one f32 logits block is <= ~2 MiB
    # (double-buffered inputs then stay well inside scoped VMEM on all generations,
    # including v7x's 64 MiB physical VMEM).
    if block_anchors is None:
        ta_cap = max(_LANE, ((2 * 1024 * 1024) // (C * 4)) // _LANE * _LANE)
    else:
        ta_cap = _round_up(block_anchors, _LANE)
    ta = min(ta_cap, _round_up(N, _LANE))
    n_pad = _round_up(N, ta)

    if n_pad != N:
        pad = n_pad - N
        # Zero padding keeps all in-kernel math finite; padded lanes are sliced off below.
        x_t = jnp.pad(x_t, ((0, 0), (0, pad)))
        labels = jnp.pad(labels, (0, pad))
        w_flat = jnp.pad(w_flat, (0, pad))

    labels2 = labels.reshape(1, n_pad)
    weights2 = w_flat.reshape(1, n_pad)

    out = pl.pallas_call(
        _wce_kernel,
        out_shape=jax.ShapeDtypeStruct((1, n_pad), jnp.float32),
        grid_spec=pltpu.PrefetchScalarGridSpec(
            num_scalar_prefetch=0,
            grid=(n_pad // ta,),
            in_specs=[
                pl.BlockSpec((C, ta), lambda i: (0, i)),   # logits  (C, N)
                pl.BlockSpec((1, ta), lambda i: (0, i)),   # labels  (1, N)
                pl.BlockSpec((1, ta), lambda i: (0, i)),   # weights (1, N)
            ],
            out_specs=pl.BlockSpec((1, ta), lambda i: (0, i)),
        ),
        compiler_params=pltpu.CompilerParams(
            dimension_semantics=("parallel",),
            vmem_limit_bytes=32 * 1024 * 1024,
        ),
    )(x_t, labels2, weights2)

    return out.reshape(n_pad)[:N].reshape(B, A)


def _reference(logits, target, weights):
    # Pure-JAX reference matching F.cross_entropy(input.permute(0,2,1), target.argmax(-1)) * weights
    logits = logits.astype(jnp.float32)
    labels = jnp.argmax(target, axis=-1)
    lse = jax.nn.logsumexp(logits, axis=-1)
    tgt = jnp.take_along_axis(logits, labels[..., None], axis=-1)[..., 0]
    return (lse - tgt) * weights.astype(jnp.float32)


if __name__ == "__main__":
    key = jax.random.PRNGKey(0)

    # Case 1: small canonical shapes, f32.
    B, A, C = 2, 16, 8
    k1, k2, k3, key = jax.random.split(key, 4)
    logits = jax.random.normal(k1, (B, A, C), dtype=jnp.float32)
    labels = jax.random.randint(k2, (B, A), 0, C)
    target = jax.nn.one_hot(labels, C, dtype=jnp.float32)
    weights = jax.random.uniform(k3, (B, A), dtype=jnp.float32)

    loss = jax.block_until_ready(weighted_cross_entropy_loss(logits, target, weights))
    ref = _reference(logits, target, weights)
    assert loss.shape == (B, A)
    assert jnp.allclose(loss, ref, atol=1e-5, rtol=1e-5), "case1 mismatch vs reference"

    # Case 2: non-multiple-of-128 anchors, odd class count, bf16 logits/weights
    # (exercises the padding path and the in-kernel f32 upcast).
    B2, A2, C2 = 2, 200, 5
    k1, k2, k3, key = jax.random.split(key, 4)
    logits2 = jax.random.normal(k1, (B2, A2, C2), dtype=jnp.float32).astype(jnp.bfloat16)
    labels2 = jax.random.randint(k2, (B2, A2), 0, C2)
    target2 = jax.nn.one_hot(labels2, C2, dtype=jnp.float32)
    weights2 = jax.random.uniform(k3, (B2, A2), dtype=jnp.float32).astype(jnp.bfloat16)

    loss2 = jax.block_until_ready(weighted_cross_entropy_loss(logits2, target2, weights2))
    ref2 = _reference(logits2, target2, weights2)
    assert loss2.shape == (B2, A2)
    assert jnp.allclose(loss2, ref2, atol=1e-5, rtol=1e-5), "case2 mismatch vs reference"

    # Case 3: force a small anchor tile so the 1-D grid has multiple steps
    # (exercises the pipelined multi-block path).
    B3, A3, C3 = 2, 300, 8
    k1, k2, k3, key = jax.random.split(key, 4)
    logits3 = jax.random.normal(k1, (B3, A3, C3), dtype=jnp.float32)
    labels3 = jax.random.randint(k2, (B3, A3), 0, C3)
    target3 = jax.nn.one_hot(labels3, C3, dtype=jnp.float32)
    weights3 = jax.random.uniform(k3, (B3, A3), dtype=jnp.float32)

    loss3 = jax.block_until_ready(
        weighted_cross_entropy_loss(logits3, target3, weights3, block_anchors=128))
    ref3 = _reference(logits3, target3, weights3)
    assert loss3.shape == (B3, A3)
    assert jnp.allclose(loss3, ref3, atol=1e-5, rtol=1e-5), "case3 mismatch vs reference"

    # TODO(synk): use_sigmoid=True branch (binary_cross_entropy_with_logits) not exercised;
    # default module config (use_sigmoid=False) is implemented here.
    print("KERNEL_OK")
</pallas_src>

<mosaic_0001>
module attributes {stable_mosaic.version = 11 : i64} {
  func.func @_wce_kernel(%arg0: i32, %arg1: memref<8x128xf32, #tpu.memory_space<vmem>>, %arg2: memref<1x128xi32, #tpu.memory_space<vmem>>, %arg3: memref<1x128xf32, #tpu.memory_space<vmem>>, %arg4: memref<1x128xf32, #tpu.memory_space<vmem>>) attributes {dimension_semantics = [#tpu.dimension_semantics<parallel>], iteration_bounds = array<i64: 1>, scalar_prefetch = 0 : i64, scratch_operands = 0 : i64, tpu.core_type = #tpu.core_type<tc>, window_params = [{transform_indices = @transform_0, window_bounds = array<i64: 8, 128>}, {transform_indices = @transform_1, window_bounds = array<i64: 1, 128>}, {transform_indices = @transform_2, window_bounds = array<i64: 1, 128>}, {transform_indices = @transform_3, window_bounds = array<i64: 1, 128>}]} {
    %c0 = arith.constant 0 : index
    %c0_0 = arith.constant 0 : index
    %0 = vector.load %arg1[%c0, %c0_0] : memref<8x128xf32, #tpu.memory_space<vmem>>, vector<8x128xf32>
    %c0_1 = arith.constant 0 : index
    %c0_2 = arith.constant 0 : index
    %1 = vector.load %arg2[%c0_1, %c0_2] : memref<1x128xi32, #tpu.memory_space<vmem>>, vector<1x128xi32>
    %c0_3 = arith.constant 0 : index
    %c0_4 = arith.constant 0 : index
    %2 = vector.load %arg3[%c0_3, %c0_4] : memref<1x128xf32, #tpu.memory_space<vmem>>, vector<1x128xf32>
    %cst = arith.constant dense<0xFF800000> : vector<128xf32>
    %3 = vector.multi_reduction <maximumf>, %0, %cst [0] : vector<8x128xf32> to vector<128xf32>
    %4 = vector.shape_cast %3 : vector<128xf32> to vector<1x128xf32>
    %5 = vector.broadcast %4 : vector<1x128xf32> to vector<8x128xf32>
    %6 = arith.subf %0, %5 : vector<8x128xf32>
    %7 = math.exp %6 : vector<8x128xf32>
    %cst_5 = arith.constant dense<0.000000e+00> : vector<128xf32>
    %8 = vector.multi_reduction <add>, %7, %cst_5 [0] : vector<8x128xf32> to vector<128xf32>
    %9 = vector.shape_cast %8 : vector<128xf32> to vector<1x128xf32>
    %10 = math.log %9 : vector<1x128xf32>
    %11 = arith.addf %4, %10 : vector<1x128xf32>
    %12 = tpu.iota {dimensions = array<i32: 0>} : vector<8x128xi32>
    %13 = vector.broadcast %1 : vector<1x128xi32> to vector<8x128xi32>
    %14 = arith.cmpi eq, %12, %13 : vector<8x128xi32>
    %cst_6 = arith.constant 0.000000e+00 : f32
    %15 = vector.broadcast %cst_6 : f32 to vector<8x128xf32>
    %16 = arith.select %14, %0, %15 : vector<8x128xi1>, vector<8x128xf32>
    %cst_7 = arith.constant dense<0.000000e+00> : vector<128xf32>
    %17 = vector.multi_reduction <add>, %16, %cst_7 [0] : vector<8x128xf32> to vector<128xf32>
    %18 = vector.shape_cast %17 : vector<128xf32> to vector<1x128xf32>
    %19 = arith.subf %11, %18 : vector<1x128xf32>
    %20 = arith.mulf %19, %2 : vector<1x128xf32>
    %c0_8 = arith.constant 0 : index
    %c0_9 = arith.constant 0 : index
    %21 = vector.load %arg4[%c0_8, %c0_9] : memref<1x128xf32, #tpu.memory_space<vmem>>, vector<1x128xf32>
    tpu.vector_store %arg4[%c0_8, %c0_9], %20 {strides = array<i32>} : memref<1x128xf32, #tpu.memory_space<vmem>>, vector<1x128xf32>,
    return
  }
  func.func @transform_0(%arg0: i32) -> (i32, i32) {
    %c0_i32 = arith.constant 0 : i32
    %c0_i32_0 = arith.constant 0 : i32
    return %c0_i32, %arg0 : i32, i32
  }
  func.func @transform_1(%arg0: i32) -> (i32, i32) {
    %c0_i32 = arith.constant 0 : i32
    %c0_i32_0 = arith.constant 0 : i32
    return %c0_i32, %arg0 : i32, i32
  }
  func.func @transform_2(%arg0: i32) -> (i32, i32) {
    %c0_i32 = arith.constant 0 : i32
    %c0_i32_0 = arith.constant 0 : i32
    return %c0_i32, %arg0 : i32, i32
  }
  func.func @transform_3(%arg0: i32) -> (i32, i32) {
    %c0_i32 = arith.constant 0 : i32
    %c0_i32_0 = arith.constant 0 : i32
    return %c0_i32, %arg0 : i32, i32
  }
}

</mosaic_0001>

<bundles_post_ra>
// kernel: tpu_custom_call.1
= control target key start
LH: loop header
LB: loop body
LE: loop exit
PB: predicated region body
PF: predicated region fallthrough
CT: control target
= control target key end

     0   :  { %8 = vsyncpa [#allocation3], 0  ;;  %s165_s0 = inlined_call_operand.hbm [shape: f32[8,128], index: 0, kind: input, shape index: {}]   ;;  %s166_s1 = inlined_call_operand.vmem [shape: s32[1,128], index: 1, kind: input, shape index: {}]   ;;  %s167_s2 = inlined_call_operand.vmem [shape: f32[1,128], index: 2, kind: input, shape index: {}]   ;;  %s168_s3 = inlined_call_operand.hbm [shape: f32[1,128], index: 3, kind: output, shape index: {}]  }
   0x1   :  { %9 = vsyncpa [#allocation4], 0  ;;  %s131_s12 = smov [#allocation2]  }
   0x2   :  { %s16_s13 = sshll.u32 %s131_s12, 4  ;;  %s17_s13 = int_to_ptr.vmem [resolvable:$true] %s16_s13 }
   0x3   :  { %s95_s14 = scalar_lea.vmem %s17_s13, 128  ;;  %p100_p1 = scmp.lt.s32.totalorder %s17_s13, %s17_s13 }
   0x4   :  { %p96_p0 = scmp.ne.s32.totalorder %s17_s13, %s95_s14  ;;  %p101_p2 = scmp.lt.s32.totalorder %s95_s14, %s95_s14 }
   0x6   :  { %p102_p3 = por %p101_p2, %p100_p1 }
   0x8   :  { %p103_p4 = pnand %p102_p3, %p96_p0 }
   0xa   :  { %106 = shalt.err (!%p103_p4)
}
   0xb   :  { %19 = dma.hbm_to_vmem [thread:$0]  %s165_s0, 128, %s17_s13, [#allocation3]  }
   0xc   :  { %127 = dma.done.wait [#allocation3], 128  }
   0xd   :  { %128 = vsyncadd [#allocation3], 4294967168  ;;  %v27_v0 = vld [vmem:[#allocation2] sm:$0xff]  ;;  %v48_v9 = vlaneseq  ;;  %s132_s19 = smov [#allocation5]  }
   0xe   :  { %v30_v1 = vrot.slane %v27_v0, 4  ;;  %v80_v11 = vld [vmem:[%s166_s1] ss:$0 sm:$0xff]  ;;  %s71_s20 = sshll.u32 %s132_s19, 4  ;;  %s72_s20 = int_to_ptr.vmem [resolvable:$true] %s71_s20 }
   0xf   :  { %v49_v10 = vshrl.u32 %v48_v9, 7  ;;  %v29_v29 = vld [vmem:[%s167_s2] sm:$0x1]  ;;  %s107_s21 = scalar_lea.vmem %s72_s20, 16  ;;  %s111_s22 = scalar_lea.vmem %s72_s20, 32 }
  0x10   :  { %v31_v2 = vmax.f32 %v27_v0, %v30_v1  ;;  %p108_p5 = scmp.ne.s32.totalorder %s72_s20, %s107_s21  ;;  %p112_p6 = scmp.lt.s32.totalorder %s72_s20, %s72_s20 }
  0x11   :  { %vm54_vm0 = vcmp.eq.s32.totalorder %v49_v10, %v80_v11  ;;  %p113_p7 = scmp.lt.s32.totalorder %s111_s22, %s107_s21 }
  0x12   :  { %v32_v3 = vrot.slane %v31_v2, 2  ;;  %v55_v15 = vsel %vm54_vm0, %v27_v0, 0.0 }
  0x13   :  { %v56_v18 = vrot.slane %v55_v15, 4  ;;  %p114_p8 = por %p113_p7, %p112_p6 }
  0x14   :  { %v33_v4 = vmax.f32 %v31_v2, %v32_v3 }
  0x15   :  { %v57_v21 = vadd.f32 %v56_v18, %v55_v15  ;;  %p115_p9 = pnand %p114_p8, %p108_p5 }
  0x16   :  { %v34_v5 = vrot.slane %v33_v4, 1 }
  0x17   :  { %v58_v22 = vrot.slane %v57_v21, 2 }
  0x18   :  { %v35_v6 = vmax.f32 %v33_v4, %v34_v5 }
  0x19   :  { %v59_v23 = vadd.f32 %v58_v22, %v57_v21 }
  0x1a   :  { %v36_v7 = vsub.f32 %v27_v0, %v35_v6 }
  0x1b   :  { %v60_v24 = vrot.slane %v59_v23, 1 }
  0x1c   :  { %v37_v8 = vmul.f32 1.442695, %v36_v7 }
  0x1d   :  { %v61_v27 = vadd.f32 %v60_v24, %v59_v23 }
  0x1e   :  { %83 = vpow2.f32 %v37_v8 }
  0x2b   :  { %v84_v12 = vpop.eup %83 }
  0x2c   :  { %v39_v13 = vrot.slane %v84_v12, 4 }
  0x2e   :  { %v40_v14 = vadd.f32 %v84_v12, %v39_v13 }
  0x30   :  { %v41_v16 = vrot.slane %v40_v14, 2 }
  0x32   :  { %v42_v17 = vadd.f32 %v41_v16, %v40_v14 }
  0x34   :  { %v43_v19 = vrot.slane %v42_v17, 1 }
  0x36   :  { %v44_v20 = vadd.f32 %v43_v19, %v42_v17 }
  0x38   :  { %85 = vlog2.f32 %v44_v20 }
  0x45   :  { %v86_v25 = vpop.eup %85 }
  0x46   :  { %v46_v26 = vmul.f32 0.6931472, %v86_v25 }
  0x48   :  { %v47_v28 = vadd.f32 %v46_v26, %v35_v6 }
  0x4a   :  { %v62_v30 = vsub.f32 %v47_v28, %v61_v27 }
  0x4c   :  { %v63_v31 = vmul.f32 %v62_v30, %v29_v29 }
  0x4e   :  { %64 = vst [vmem:[#allocation5] sm:$0x1] %v63_v31 }
  0x4f   :  { %118 = shalt.err (!%p115_p9)
}
  0x50   :  { %74 = dma.vmem_to_hbm [thread:$0]  %s72_s20, 16, %s168_s3, [#allocation4]  }
  0x51   :  { %129 = dma.done.wait [#allocation4], 16  }
  0x52   :  { %130 = vsyncadd [#allocation4], 4294967280 }
  0x53   :  { %78 = vsyncpa [#allocation3], 1 }
  0x54   :  { %79 = vsyncpa [#allocation4], 1 }

</bundles_post_ra>
